<compile_context>
chip_gen: v7x
topology: tpu7x:2x2x1
jax: 0.10.0
libtpu: 0.0.40
codegen_flags: <defaults>
</compile_context>

<pallas_src>
import jax
import jax.numpy as jnp
from jax.experimental import pallas as pl
from jax.experimental.pallas import tpu as pltpu


# ----------------------------- small helpers --------------------------------

def _ceil_div(a, b):
    return -(-a // b)


def _round_up(v, m):
    return _ceil_div(v, m) * m


def _round_down(v, m):
    return (v // m) * m


def _vmem_budget_bytes():
    """Generation-aware (pipeline-buffer budget, compiler vmem limit)."""
    cap = None
    try:
        cap = getattr(pltpu.get_tpu_info(), "vmem_capacity_bytes", None)
    except Exception:
        cap = None
    if cap is None:
        cap = 64 * 1024 * 1024                      # conservative fallback
    if cap >= 100 * 1024 * 1024:                    # v5e / v6e: 128 MiB physical
        return 48 * 1024 * 1024, 64 * 1024 * 1024
    else:                                           # v7x: 64 MiB physical
        return 20 * 1024 * 1024, 40 * 1024 * 1024


# ------------------------------- kernel --------------------------------------

def _make_kernel(num_layers, stacked_input):
    """Kernel: o = sum_l w[l] * x_l, with w already softmax-normalized (SMEM)."""

    def kernel(w_ref, *refs):
        o_ref = refs[-1]
        if stacked_input:
            x_ref = refs[0]                          # (L, tm, LANE)
            acc = x_ref[0].astype(jnp.float32) * w_ref[0]
            for l in range(1, num_layers):           # static, small, unrolled
                acc = acc + x_ref[l].astype(jnp.float32) * w_ref[l]
        else:
            acc = refs[0][...].astype(jnp.float32) * w_ref[0]
            for l in range(1, num_layers):
                acc = acc + refs[l][...].astype(jnp.float32) * w_ref[l]
        o_ref[...] = acc.astype(o_ref.dtype)

    return kernel


def _mix_pallas_2d(xs, norm_w, rows, lane, in_dtype, out_dtype, stacked_input):
    """Weighted sum of L layers, each viewed as a lane-dense (rows, lane) slab."""
    num_layers = int(norm_w.shape[0])
    in_bytes = jnp.dtype(in_dtype).itemsize
    out_bytes = jnp.dtype(out_dtype).itemsize

    vmem_budget, vmem_limit = _vmem_budget_bytes()

    # dtype-native sublane multiple (sub-32-bit dtypes pack along sublanes)
    sub = max(8, 32 // max(1, in_bytes))             # 8 f32, 16 bf16, 32 int8/fp8

    # Bytes-driven row-tile sizing: double-buffered input + output tiles plus
    # f32 accumulator / cast-temp headroom (~2 live f32 temporaries per tile).
    per_row_bytes = (2 * num_layers * lane * in_bytes
                     + 2 * lane * out_bytes
                     + 2 * lane * 4)
    tm_cap = max(sub, vmem_budget // per_row_bytes)

    if rows <= sub:
        tm = rows                                    # full-extent block (legal)
    else:
        tm = _round_down(min(tm_cap, rows), sub)
        steps = _ceil_div(rows, tm)
        if steps == 1:
            steps = 2                                # keep both v7x cores busy
        elif 2 < steps <= 8 and steps % 2 == 1:
            steps += 1                               # even step count for megacore
        if steps <= 8:
            tm = min(tm, _round_up(_ceil_div(rows, steps), sub))
    grid = (_ceil_div(rows, tm),)                    # partial last tile is masked

    # Weights live in SMEM (untiled operand, copied once).
    w_spec = pl.BlockSpec(memory_space=pltpu.MemorySpace.SMEM)

    if stacked_input:
        in_specs = [w_spec,
                    pl.BlockSpec((num_layers, tm, lane), lambda i: (0, i, 0))]
        operands = (norm_w, xs)
    else:
        in_specs = [w_spec] + [
            pl.BlockSpec((tm, lane), lambda i: (i, 0)) for _ in range(num_layers)
        ]
        operands = (norm_w, *xs)

    n_total = rows * lane
    cost = pl.CostEstimate(
        flops=2 * num_layers * n_total,
        transcendentals=0,
        bytes_accessed=num_layers * n_total * in_bytes + n_total * out_bytes,
    )

    out = pl.pallas_call(
        _make_kernel(num_layers, stacked_input),
        out_shape=jax.ShapeDtypeStruct((rows, lane), out_dtype),
        grid_spec=pltpu.PrefetchScalarGridSpec(
            num_scalar_prefetch=0,
            grid=grid,
            in_specs=in_specs,
            out_specs=pl.BlockSpec((tm, lane), lambda i: (i, 0)),
        ),
        compiler_params=pltpu.CompilerParams(
            dimension_semantics=("parallel",),
            vmem_limit_bytes=vmem_limit,
        ),
        cost_estimate=cost,
    )(*operands)
    return out


# ------------------------------- wrapper --------------------------------------

def scalar_mix(tensors, scalars):
    """Pallas ScalarMix forward.

    tensors: list/tuple of identically-shaped arrays, or one stacked (L, ...)
             array.
    scalars: (L,) raw mixing parameters (softmax applied in the wrapper).
    Returns: array shaped like a single layer tensor (promoted like PyTorch:
             sub-f32 inputs * f32 weights -> f32 output).
    """
    if isinstance(tensors, (list, tuple)):
        layers = list(tensors)
        stacked_input = False
        num_layers = len(layers)
        out_shape = layers[0].shape
        in_dtype = layers[0].dtype
    else:
        layers = tensors
        stacked_input = True
        num_layers = int(tensors.shape[0])
        out_shape = tensors.shape[1:]
        in_dtype = tensors.dtype

    n_elems = 1
    for d in out_shape:
        n_elems *= int(d)

    # softmax once in the wrapper (matches torch.nn.functional.softmax(w, 0)).
    norm_w = jax.nn.softmax(jnp.asarray(scalars, jnp.float32).reshape(-1), axis=0)
    out_dtype = jnp.result_type(in_dtype, norm_w.dtype)

    # --- main path: lane-dense (rows, LANE) with LANE a multiple of 128 that
    #     divides n_elems (free, metadata-only reshape).
    if n_elems > 0 and n_elems % 128 == 0:
        lane = 128
        for cand in range(2048, 128, -128):
            if n_elems % cand == 0:
                lane = cand
                break
        rows = n_elems // lane
        if stacked_input:
            xs = layers.reshape(num_layers, rows, lane)
        else:
            xs = [t.reshape(rows, lane) for t in layers]
        out = _mix_pallas_2d(xs, norm_w, rows, lane, in_dtype, out_dtype,
                             stacked_input)
        return out.reshape(out_shape)

    # --- fallback: n_elems not a multiple of 128.  Bulk floor(n/128)*128
    #     elements go through the lane-dense kernel; the <128-element tail is
    #     mixed in plain JAX.  No whole-array pad copy.
    bulk_rows = n_elems // 128
    bulk = bulk_rows * 128

    if stacked_input:
        flat = layers.reshape(num_layers, n_elems)
        tail_stacked = flat[:, bulk:]
    else:
        flat = [t.reshape(n_elems) for t in layers]
        tail_stacked = jnp.stack([f[bulk:] for f in flat])
    tail_out = (tail_stacked.astype(jnp.float32) * norm_w[:, None]
                ).sum(axis=0).astype(out_dtype)

    if bulk_rows == 0:
        return tail_out.reshape(out_shape)

    # TODO(synk): the prefix slices below may materialize a copy in XLA; a
    # fused-remainder kernel would avoid it entirely.
    if stacked_input:
        xs = flat[:, :bulk].reshape(num_layers, bulk_rows, 128)
    else:
        xs = [f[:bulk].reshape(bulk_rows, 128) for f in flat]
    bulk_out = _mix_pallas_2d(xs, norm_w, bulk_rows, 128, in_dtype, out_dtype,
                              stacked_input)
    return jnp.concatenate([bulk_out.reshape(-1), tail_out],
                           axis=0).reshape(out_shape)


def scalar_mix_ref(tensors, scalars):
    """Pure-JAX reference matching the PyTorch forward exactly."""
    if isinstance(tensors, (list, tuple)):
        stacked = jnp.stack(tensors)
    else:
        stacked = tensors
    norm_w = jax.nn.softmax(jnp.asarray(scalars, jnp.float32), axis=0).reshape(
        (-1,) + (1,) * (stacked.ndim - 1))
    return (stacked * norm_w).sum(axis=0)


# -------------------------------- tests ---------------------------------------

if __name__ == "__main__":
    key = jax.random.PRNGKey(0)
    k1, k2, k3, k4, k5 = jax.random.split(key, 5)

    # --- test 1: list-of-tensors path, f32, small module-spec shapes
    mix_dim = 4
    batch, seq, hidden = 2, 8, 32
    keys = jax.random.split(k1, mix_dim)
    tensors = [jax.random.normal(k, (batch, seq, hidden), dtype=jnp.float32)
               for k in keys]
    scalars = 0.1 * jnp.arange(mix_dim, dtype=jnp.float32)
    out = jax.block_until_ready(scalar_mix(tensors, scalars))
    ref = scalar_mix_ref(tensors, scalars)
    assert out.shape == (batch, seq, hidden)
    assert jnp.allclose(out, ref, atol=1e-5, rtol=1e-5), "mismatch (list path)"

    # --- test 2: pre-stacked path, non-dividing row count (grid > 1, masked
    #             partial last tile)
    stacked = jax.random.normal(k2, (3, 4, 37, 96), dtype=jnp.float32)
    scalars2 = jnp.array([0.3, -0.1, 0.5], jnp.float32)
    out2 = jax.block_until_ready(scalar_mix(stacked, scalars2))
    ref2 = scalar_mix_ref(stacked, scalars2)
    assert out2.shape == (4, 37, 96)
    assert jnp.allclose(out2, ref2, atol=1e-5, rtol=1e-5), "mismatch (stacked path)"

    # --- test 3: bf16 list path, L=13 (ELMo-style), exercises sublane=16
    #             rounding, grid of 2 steps and f32-promoted output
    L3 = 13
    keys3 = jax.random.split(k3, L3)
    tensors3 = [jax.random.normal(k, (4, 128, 80), dtype=jnp.bfloat16)
                for k in keys3]
    scalars3 = 0.05 * jnp.arange(L3, dtype=jnp.float32) - 0.3
    out3 = jax.block_until_ready(scalar_mix(tensors3, scalars3))
    ref3 = scalar_mix_ref(tensors3, scalars3)
    assert out3.shape == (4, 128, 80) and out3.dtype == jnp.float32
    assert jnp.allclose(out3, ref3, atol=1e-4, rtol=1e-4), "mismatch (bf16 path)"

    # --- test 4: n_elems not a multiple of 128 -> lane-dense bulk + JAX tail
    keys4 = jax.random.split(k4, 3)
    tensors4 = [jax.random.normal(k, (2, 10, 10), dtype=jnp.float32)
                for k in keys4]
    scalars4 = jnp.array([0.2, -0.4, 0.1], jnp.float32)
    out4 = jax.block_until_ready(scalar_mix(tensors4, scalars4))
    ref4 = scalar_mix_ref(tensors4, scalars4)
    assert out4.shape == (2, 10, 10)
    assert jnp.allclose(out4, ref4, atol=1e-5, rtol=1e-5), "mismatch (split path)"

    # --- test 5: tiny pre-stacked input (< 128 elements) -> pure tail path
    stacked5 = jax.random.normal(k5, (4, 3, 5, 7), dtype=jnp.float32)
    scalars5 = jnp.array([0.1, 0.0, -0.2, 0.3], jnp.float32)
    out5 = jax.block_until_ready(scalar_mix(stacked5, scalars5))
    ref5 = scalar_mix_ref(stacked5, scalars5)
    assert out5.shape == (3, 5, 7)
    assert jnp.allclose(out5, ref5, atol=1e-5, rtol=1e-5), "mismatch (tail path)"

    print("KERNEL_OK")
</pallas_src>

<mosaic_0001>
module attributes {stable_mosaic.version = 11 : i64} {
  func.func @kernel(%arg0: i32, %arg1: memref<4xf32, #tpu.memory_space<smem>>, %arg2: memref<1x512xf32, #tpu.memory_space<vmem>>, %arg3: memref<1x512xf32, #tpu.memory_space<vmem>>, %arg4: memref<1x512xf32, #tpu.memory_space<vmem>>, %arg5: memref<1x512xf32, #tpu.memory_space<vmem>>, %arg6: memref<1x512xf32, #tpu.memory_space<vmem>>) attributes {dimension_semantics = [#tpu.dimension_semantics<parallel>], iteration_bounds = array<i64: 1>, scalar_prefetch = 0 : i64, scratch_operands = 0 : i64, tpu.core_type = #tpu.core_type<tc>, window_params = [{transform_indices = @transform_0, window_bounds = array<i64: 4>}, {transform_indices = @transform_1, window_bounds = array<i64: 1, 512>}, {transform_indices = @transform_2, window_bounds = array<i64: 1, 512>}, {transform_indices = @transform_3, window_bounds = array<i64: 1, 512>}, {transform_indices = @transform_4, window_bounds = array<i64: 1, 512>}, {transform_indices = @transform_5, window_bounds = array<i64: 1, 512>}]} {
    %c0 = arith.constant 0 : index
    %c0_0 = arith.constant 0 : index
    %0 = vector.load %arg2[%c0, %c0_0] : memref<1x512xf32, #tpu.memory_space<vmem>>, vector<1x512xf32>
    %c0_1 = arith.constant 0 : index
    %1 = memref.load %arg1[%c0_1] : memref<4xf32, #tpu.memory_space<smem>>
    %2 = vector.broadcast %1 : f32 to vector<1x512xf32>
    %3 = arith.mulf %0, %2 : vector<1x512xf32>
    %c0_2 = arith.constant 0 : index
    %c0_3 = arith.constant 0 : index
    %4 = vector.load %arg3[%c0_2, %c0_3] : memref<1x512xf32, #tpu.memory_space<vmem>>, vector<1x512xf32>
    %c1 = arith.constant 1 : index
    %5 = memref.load %arg1[%c1] : memref<4xf32, #tpu.memory_space<smem>>
    %6 = vector.broadcast %5 : f32 to vector<1x512xf32>
    %7 = arith.mulf %4, %6 : vector<1x512xf32>
    %8 = arith.addf %3, %7 : vector<1x512xf32>
    %c0_4 = arith.constant 0 : index
    %c0_5 = arith.constant 0 : index
    %9 = vector.load %arg4[%c0_4, %c0_5] : memref<1x512xf32, #tpu.memory_space<vmem>>, vector<1x512xf32>
    %c2 = arith.constant 2 : index
    %10 = memref.load %arg1[%c2] : memref<4xf32, #tpu.memory_space<smem>>
    %11 = vector.broadcast %10 : f32 to vector<1x512xf32>
    %12 = arith.mulf %9, %11 : vector<1x512xf32>
    %13 = arith.addf %8, %12 : vector<1x512xf32>
    %c0_6 = arith.constant 0 : index
    %c0_7 = arith.constant 0 : index
    %14 = vector.load %arg5[%c0_6, %c0_7] : memref<1x512xf32, #tpu.memory_space<vmem>>, vector<1x512xf32>
    %c3 = arith.constant 3 : index
    %15 = memref.load %arg1[%c3] : memref<4xf32, #tpu.memory_space<smem>>
    %16 = vector.broadcast %15 : f32 to vector<1x512xf32>
    %17 = arith.mulf %14, %16 : vector<1x512xf32>
    %18 = arith.addf %13, %17 : vector<1x512xf32>
    %c0_8 = arith.constant 0 : index
    %c0_9 = arith.constant 0 : index
    %19 = vector.load %arg6[%c0_8, %c0_9] : memref<1x512xf32, #tpu.memory_space<vmem>>, vector<1x512xf32>
    tpu.vector_store %arg6[%c0_8, %c0_9], %18 {strides = array<i32>} : memref<1x512xf32, #tpu.memory_space<vmem>>, vector<1x512xf32>,
    return
  }
  func.func @transform_0(%arg0: i32) -> i32 {
    %c0_i32 = arith.constant 0 : i32
    %c0_i32_0 = arith.constant 0 : i32
    return %c0_i32 : i32
  }
  func.func @transform_1(%arg0: i32) -> (i32, i32) {
    %c0_i32 = arith.constant 0 : i32
    %c0_i32_0 = arith.constant 0 : i32
    return %arg0, %c0_i32 : i32, i32
  }
  func.func @transform_2(%arg0: i32) -> (i32, i32) {
    %c0_i32 = arith.constant 0 : i32
    %c0_i32_0 = arith.constant 0 : i32
    return %arg0, %c0_i32 : i32, i32
  }
  func.func @transform_3(%arg0: i32) -> (i32, i32) {
    %c0_i32 = arith.constant 0 : i32
    %c0_i32_0 = arith.constant 0 : i32
    return %arg0, %c0_i32 : i32, i32
  }
  func.func @transform_4(%arg0: i32) -> (i32, i32) {
    %c0_i32 = arith.constant 0 : i32
    %c0_i32_0 = arith.constant 0 : i32
    return %arg0, %c0_i32 : i32, i32
  }
  func.func @transform_5(%arg0: i32) -> (i32, i32) {
    %c0_i32 = arith.constant 0 : i32
    %c0_i32_0 = arith.constant 0 : i32
    return %arg0, %c0_i32 : i32, i32
  }
}

</mosaic_0001>

<bundles_post_ra>
// kernel: tpu_custom_call.1
= control target key start
LH: loop header
LB: loop body
LE: loop exit
PB: predicated region body
PF: predicated region fallthrough
CT: control target
= control target key end

     0   :  { %10 = vsyncpa [#allocation5], 0  ;;  %s228_s0 = inlined_call_operand.hbm [shape: f32[4], index: 0, kind: input, shape index: {}]   ;;  %s229_s1 = inlined_call_operand.hbm [shape: f32[1,512], index: 1, kind: input, shape index: {}]   ;;  %s230_s2 = inlined_call_operand.vmem [shape: f32[1,512], index: 2, kind: input, shape index: {}]   ;;  %s231_s3 = inlined_call_operand.vmem [shape: f32[1,512], index: 3, kind: input, shape index: {}]   ;;  %s232_s4 = inlined_call_operand.vmem [shape: f32[1,512], index: 4, kind: input, shape index: {}]   ;;  %s233_s5 = inlined_call_operand.hbm [shape: f32[1,512], index: 5, kind: output, shape index: {}]  }
   0x1   :  { %11 = vsyncpa [#allocation3], 0 }
   0x2   :  { %12 = vsyncpa [#allocation4], 0  ;;  %s90_s20 = scalar_lea.hbm %s228_s0, 16 }
   0x3   :  { %p91_p0 = scmp.ne.s32.totalorder %s228_s0, %s90_s20  ;;  %p94_p1 = scmp.lt.u32.totalorder %s90_s20, %s228_s0 }
   0x5   :  { %p96_p2 = pnand %p94_p1, %p91_p0 }
   0x7   :  { %99 = shalt.err (!%p96_p2)
}
   0x8   :  { %s150_s25 = smov [#allocation2]   ;;  %s151_s28 = smov [#allocation6]  }
   0x9   :  { %20 = dma.hbm_to_smem %s228_s0, 16, %s150_s25, [#allocation5]  }
   0xa   :  { %s27_s29 = sshll.u32 %s151_s28, 4  ;;  %s100_s7 = scalar_lea.hbm %s229_s1, 64  ;;  %s28_s29 = int_to_ptr.vmem [resolvable:$true] %s27_s29 }
   0xb   :  { %p101_p3 = scmp.ne.s32.totalorder %s229_s1, %s100_s7  ;;  %p104_p4 = scmp.lt.u32.totalorder %s100_s7, %s229_s1 }
   0xd   :  { %p106_p5 = pnand %p104_p4, %p101_p3 }
   0xf   :  { %109 = shalt.err (!%p106_p5)
}
  0x10   :  { %s110_s12 = scalar_lea.vmem %s28_s29, 64  ;;  %p115_p7 = scmp.lt.s32.totalorder %s28_s29, %s28_s29 }
  0x11   :  { %p111_p6 = scmp.ne.s32.totalorder %s28_s29, %s110_s12  ;;  %p116_p8 = scmp.lt.s32.totalorder %s110_s12, %s110_s12 }
  0x13   :  { %p117_p9 = por %p116_p8, %p115_p7 }
  0x15   :  { %p118_p10 = pnand %p117_p9, %p111_p6 }
  0x17   :  { %121 = shalt.err (!%p118_p10)
}
  0x18   :  { %30 = dma.hbm_to_vmem [thread:$0]  %s229_s1, 64, %s28_s29, [#allocation3]  }
  0x19   :  { %144 = dma.done.wait [#allocation5], 16  }
  0x1a   :  { %145 = vsyncadd [#allocation5], 4294967280 }
  0x1b   :  { %146 = dma.done.wait [#allocation3], 64  }
  0x1c   :  { %147 = vsyncadd [#allocation3], 4294967232 }
  0x1d   :  { %43 = sfence }
  0x1e   :  { %s45_s14 = sld [smem:[#allocation2]]  ;;  %s84_s15 = sld [smem:[#allocation2 + $0x1]]  ;;  %v44_v0 = vld [vmem:[#allocation6] sm:$0xf]  ;;  %v48_v1 = vld [vmem:[%s230_s2] sm:$0xf]  ;;  %v63_v11 = vlaneseq }
  0x1f   :  { %s85_s16 = sld [smem:[#allocation2 + $0x2]]  ;;  %s86_s17 = sld [smem:[#allocation2 + $0x3]]  ;;  %v53_v2 = vld [vmem:[%s231_s3] sm:$0xf] }
  0x20   :  { %v58_v7 = vld [vmem:[%s232_s4] sm:$0xf]  ;;  %s152_s23 = smov [#allocation7]   ;;  %vm65_vm0 = vcmp.lt.s32.totalorder %v63_v11, 512 }
  0x21   :  { %s74_s2 = sshll.u32 %s152_s23, 4  ;;  %s75_s2 = int_to_ptr.vmem [resolvable:$true] %s74_s2 }
  0x22   :  { %s122_s3 = scalar_lea.vmem %s75_s2, 64  ;;  %p127_p12 = scmp.lt.s32.totalorder %s75_s2, %s75_s2 }
  0x23   :  { %p123_p11 = scmp.ne.s32.totalorder %s75_s2, %s122_s3  ;;  %p128_p13 = scmp.lt.s32.totalorder %s122_s3, %s122_s3 }
  0x24   :  { %v46_v3 = vstv %s45_s14  ;;  %v50_v5 = vstv %s84_s15 }
  0x25   :  { %v47_v4 = vmul.f32 %v46_v3, %v44_v0  ;;  %v55_v6 = vstv %s85_s16  ;;  %v51_v8 = vmul.f32 %v50_v5, %v48_v1  ;;  %v60_v10 = vstv %s86_s17  ;;  %p129_p0 = por %p128_p13, %p127_p12 }
  0x26   :  { %v56_v9 = vmul.f32 %v55_v6, %v53_v2  ;;  %v61_v13 = vmul.f32 %v60_v10, %v58_v7 }
  0x27   :  { %v52_v12 = vadd.f32 %v51_v8, %v47_v4  ;;  %p130_p1 = pnand %p129_p0, %p123_p11 }
  0x29   :  { %v57_v14 = vadd.f32 %v56_v9, %v52_v12 }
  0x2b   :  { %v62_v15 = vadd.f32 %v61_v13, %v57_v14 }
  0x2d   :  { %67 = vst.msk [vmem:[#allocation7] sm:$0xf] %vm65_vm0, %v62_v15 }
  0x2e   :  { %133 = shalt.err (!%p130_p1)
}
  0x2f   :  { %s134_s25 = scalar_lea.hbm %s233_s5, 64 }
  0x30   :  { %p135_p2 = scmp.ne.s32.totalorder %s233_s5, %s134_s25  ;;  %p138_p3 = scmp.lt.u32.totalorder %s134_s25, %s233_s5 }
  0x32   :  { %p140_p4 = pnand %p138_p3, %p135_p2 }
  0x34   :  { %143 = shalt.err (!%p140_p4)
}
  0x35   :  { %77 = dma.vmem_to_hbm [thread:$0]  %s75_s2, 64, %s233_s5, [#allocation4]  }
  0x36   :  { %148 = dma.done.wait [#allocation4], 64  }
  0x37   :  { %149 = vsyncadd [#allocation4], 4294967232 }
  0x38   :  { %81 = vsyncpa [#allocation3], 1 }
  0x39   :  { %82 = vsyncpa [#allocation4], 1 }
  0x3a   :  { %83 = vsyncpa [#allocation5], 1 }

</bundles_post_ra>
